<compile_context>
chip_gen: v5e
topology: v5e:2x2
jax: 0.10.0
libtpu: 0.0.40
codegen_flags: <defaults>
</compile_context>

<pallas_src>
import functools

import jax
import jax.numpy as jnp
from jax.experimental import pallas as pl
from jax.experimental.pallas import tpu as pltpu

_LANES = 128
_DEFAULT_ROW_TILE = 8192   # 8192 * 128 * 4 B = 4 MiB per f32 input block.


def _round_up(x, m):
    return ((x + m - 1) // m) * m


# ---------------------------------------------------------------------------
# Pallas kernel: per-block partial sums of the four global reductions
# ---------------------------------------------------------------------------
def _wce_partial_kernel(r_ref, t_ref, m_ref, out_ref, *,
                        num_rows, row_tile, steps, total_blocks):
    s = pl.program_id(0)          # slab axis ("parallel": megacore sharding)
    k = pl.program_id(1)          # reduction axis within the slab ("arbitrary")
    blk = s * steps + k           # logical block index (may exceed total_blocks)

    @pl.when(k == 0)
    def _init():
        out_ref[...] = jnp.zeros_like(out_ref)

    r = r_ref[...].astype(jnp.float32)
    t = t_ref[...].astype(jnp.float32)
    m = m_ref[...].astype(jnp.float32)

    base = blk * row_tile
    valid_block = blk < total_blocks          # False only for the dummy step of
                                              # the shorter slab (odd block count)
    is_boundary = base + row_tile > num_rows  # block sticks past the array end

    eps = jnp.float32(1e-6)

    def accumulate(r2, t2, m2):
        tm = t2 * m2                                            # reused below
        pos = tm * jnp.log(jnp.maximum(r2, eps))
        neg = (m2 - tm) * jnp.log(jnp.maximum(1.0 - r2, eps))   # == (1-t)*m*log(.)
        # Per-lane partial sums; rows 4..7 of the accumulator stay zero.
        out_ref[0:1, :] += jnp.sum(tm, axis=0, keepdims=True)
        out_ref[1:2, :] += jnp.sum(m2, axis=0, keepdims=True)
        out_ref[2:3, :] += jnp.sum(pos, axis=0, keepdims=True)
        out_ref[3:4, :] += jnp.sum(neg, axis=0, keepdims=True)

    # Fast path: interior block, every row valid -> no iota / masking work.
    @pl.when(valid_block & jnp.logical_not(is_boundary))
    def _interior():
        accumulate(r, t, m)

    # Boundary block: rows at/after num_rows hold unspecified data -> mask them.
    # recons is clamped to 0.5 (not just the mask) so 0 * log(garbage Inf/NaN)
    # can never poison the sums.
    @pl.when(valid_block & is_boundary)
    def _boundary():
        row_id = base + jax.lax.broadcasted_iota(jnp.int32, r.shape, 0)
        valid = row_id < num_rows
        accumulate(jnp.where(valid, r, jnp.float32(0.5)),
                   jnp.where(valid, t, jnp.float32(0.0)),
                   jnp.where(valid, m, jnp.float32(0.0)))


# ---------------------------------------------------------------------------
# Wrapper: stream the three arrays once, reduce to four scalars
# ---------------------------------------------------------------------------
def _wce_partial_sums(recons, target, mask, *, row_tile=None):
    n = recons.size
    flat = [jnp.ravel(recons), jnp.ravel(target), jnp.ravel(mask)]

    pad = (-n) % _LANES
    if pad:
        # Only when the element count isn't lane-aligned. Zero padding is
        # exactly neutral: mask=0 kills both terms, recons=0 is eps-clamped.
        # NOTE: jnp.pad materializes a copy of each input; prefer inputs with
        # size % 128 == 0 so the reshape below is metadata-only (zero copy).
        flat = [jnp.pad(x, (0, pad)) for x in flat]
    num_rows = (n + pad) // _LANES
    r2, t2, m2 = [x.reshape(num_rows, _LANES) for x in flat]

    if row_tile is None:
        row_tile = min(_DEFAULT_ROW_TILE, _round_up(num_rows, 8))
    row_tile = _round_up(row_tile, 8)
    total_blocks = pl.cdiv(num_rows, row_tile)
    num_slabs = 2 if total_blocks >= 2 else 1   # 2 accumulators -> both TCs (v7x)
    steps = pl.cdiv(total_blocks, num_slabs)

    def in_map(s, k):
        # Clamp so the dummy step of the shorter slab (odd block count) stays in
        # bounds; its compute is skipped in-kernel, only its DMA is spent.
        return (jnp.minimum(s * steps + k, total_blocks - 1), 0)

    kernel = functools.partial(
        _wce_partial_kernel, num_rows=num_rows, row_tile=row_tile,
        steps=steps, total_blocks=total_blocks)

    partials = pl.pallas_call(
        kernel,
        out_shape=jax.ShapeDtypeStruct((num_slabs, 8, _LANES), jnp.float32),
        grid=(num_slabs, steps),
        in_specs=[pl.BlockSpec((row_tile, _LANES), in_map)] * 3,
        out_specs=pl.BlockSpec((None, 8, _LANES), lambda s, k: (s, 0, 0)),
        compiler_params=pltpu.CompilerParams(
            dimension_semantics=("parallel", "arbitrary"),
            vmem_limit_bytes=32 * 1024 * 1024,
        ),
    )(r2, t2, m2)

    sums = jnp.sum(partials, axis=(0, 2))       # (8,) ; rows 4..7 are zero
    return sums[0], sums[1], sums[2], sums[3]


def weighted_cross_entropy_loss(recons, target, mask, *, row_tile=None):
    num_pos, mask_sum, pos_log, neg_log = _wce_partial_sums(
        recons, target, mask, row_tile=row_tile)
    total = jnp.float32(recons.size)
    # PyTorch's `if num_positive > 0` is data-dependent -> jnp.where here.
    safe_np = jnp.where(num_pos > 0, num_pos, jnp.float32(1.0))
    ratio = mask_sum / safe_np - 1.0
    loss_pos = jnp.where(num_pos > 0, -ratio * pos_log / total, jnp.float32(0.0))
    loss_neg = -neg_log / total
    return loss_pos + loss_neg


class WeightedCrossEntropyLoss:
    """JAX/Pallas counterpart of the PyTorch module."""

    def __init__(self, device=None):
        self.device = device   # kept for API parity; JAX arrays carry placement

    def __call__(self, recons, target, mask):
        return weighted_cross_entropy_loss(recons, target, mask)

    forward = __call__


# ---------------------------------------------------------------------------
# Pure-JAX reference (mirror of the PyTorch code) for verification
# ---------------------------------------------------------------------------
def _wce_reference(recons, target, mask):
    r = recons.astype(jnp.float32)
    t = target.astype(jnp.float32)
    m = mask.astype(jnp.float32)
    eps = jnp.float32(1e-6)
    num_pos = jnp.sum(t * m)
    safe_np = jnp.where(num_pos > 0, num_pos, jnp.float32(1.0))
    ratio = jnp.sum(m) / safe_np - 1.0
    loss_pos = jnp.mean(-ratio * t * jnp.log(jnp.maximum(r, eps)) * m)
    loss_pos = jnp.where(num_pos > 0, loss_pos, jnp.float32(0.0))
    loss_neg = jnp.mean(-(1.0 - t) * jnp.log(jnp.maximum(1.0 - r, eps)) * m)
    return loss_pos + loss_neg


if __name__ == "__main__":
    key = jax.random.PRNGKey(0)

    def make_inputs(shape, k):
        kr, kt, km = jax.random.split(k, 3)
        recons = jax.random.uniform(kr, shape, jnp.float32, 1e-3, 1.0 - 1e-3)
        target = (jax.random.uniform(kt, shape) < 0.3).astype(jnp.float32)
        mask = (jax.random.uniform(km, shape) < 0.7).astype(jnp.float32)
        return recons, target, mask

    k1, k2, k3 = jax.random.split(key, 3)
    loss_mod = WeightedCrossEntropyLoss(device=None)

    # Case 1: lane-aligned SGNN-style reconstruction matrix (32x48 -> n=1536).
    recons, target, mask = make_inputs((32, 48), k1)
    out = jax.block_until_ready(jax.jit(weighted_cross_entropy_loss)(recons, target, mask))
    ref = _wce_reference(recons, target, mask)
    assert jnp.allclose(out, ref, rtol=1e-5, atol=1e-5), (out, ref)

    out_mod = jax.block_until_ready(loss_mod(recons, target, mask))
    assert jnp.allclose(out_mod, ref, rtol=1e-5, atol=1e-5), (out_mod, ref)

    # Case 2: multi-block grid with an odd block count (3 blocks over 2 slabs)
    # -> exercises the gated dummy step of the shorter slab.
    recons2, target2, mask2 = make_inputs((48, 64), k2)     # R=24, 3 blocks of 8
    out2 = jax.block_until_ready(
        weighted_cross_entropy_loss(recons2, target2, mask2, row_tile=8))
    ref2 = _wce_reference(recons2, target2, mask2)
    assert jnp.allclose(out2, ref2, rtol=1e-5, atol=1e-5), (out2, ref2)

    # Case 2b: multi-block grid where the last block is ragged (boundary path
    # taken on one slab, unmasked fast path on the other).
    out2b = jax.block_until_ready(
        weighted_cross_entropy_loss(recons2, target2, mask2, row_tile=16))
    assert jnp.allclose(out2b, ref2, rtol=1e-5, atol=1e-5), (out2b, ref2)

    # Case 3: element count not a multiple of 128 (exercises the pad fallback
    # plus in-kernel boundary masking).
    recons3, target3, mask3 = make_inputs((10, 30), k3)
    out3 = jax.block_until_ready(weighted_cross_entropy_loss(recons3, target3, mask3))
    ref3 = _wce_reference(recons3, target3, mask3)
    assert jnp.allclose(out3, ref3, rtol=1e-5, atol=1e-5), (out3, ref3)

    # Case 4: num_positive == 0 branch (all-zero target).
    zt = jnp.zeros_like(target)
    out4 = jax.block_until_ready(weighted_cross_entropy_loss(recons, zt, mask))
    ref4 = _wce_reference(recons, zt, mask)
    assert jnp.allclose(out4, ref4, rtol=1e-5, atol=1e-5), (out4, ref4)

    print("KERNEL_OK")
</pallas_src>

<mosaic_0001>
module attributes {stable_mosaic.version = 11 : i64} {
  func.func @_wce_partial_kernel(%arg0: i32, %arg1: i32, %arg2: memref<16x128xf32, #tpu.memory_space<vmem>>, %arg3: memref<16x128xf32, #tpu.memory_space<vmem>>, %arg4: memref<16x128xf32, #tpu.memory_space<vmem>>, %arg5: memref<1x8x128xf32, #tpu.memory_space<vmem>>) attributes {dimension_semantics = [#tpu.dimension_semantics<parallel>, #tpu.dimension_semantics<arbitrary>], iteration_bounds = array<i64: 1, 1>, scalar_prefetch = 0 : i64, scratch_operands = 0 : i64, tpu.core_type = #tpu.core_type<tc>, window_params = [{transform_indices = @transform_0, window_bounds = array<i64: 16, 128>}, {transform_indices = @transform_1, window_bounds = array<i64: 16, 128>}, {transform_indices = @transform_2, window_bounds = array<i64: 16, 128>}, {transform_indices = @transform_3, window_bounds = array<i64: 1, 8, 128>}]} {
    %c1_i32 = arith.constant 1 : i32
    %0 = arith.muli %arg0, %c1_i32 : i32
    %1 = arith.addi %0, %arg1 : i32
    %c0_i32 = arith.constant 0 : i32
    %2 = arith.cmpi eq, %arg1, %c0_i32 : i32
    %3 = arith.extui %2 : i1 to i32
    %c0_i32_0 = arith.constant 0 : i32
    %4 = arith.cmpi ne, %3, %c0_i32_0 : i32
    scf.if %4 {
      %cst_11 = arith.constant 0.000000e+00 : f32
      %19 = vector.broadcast %cst_11 : f32 to vector<8x128xf32>
      %c0_12 = arith.constant 0 : index
      %c0_13 = arith.constant 0 : index
      %c0_14 = arith.constant 0 : index
      %20 = vector.load %arg5[%c0_12, %c0_13, %c0_14] : memref<1x8x128xf32, #tpu.memory_space<vmem>>, vector<1x8x128xf32>
      %21 = vector.shape_cast %20 : vector<1x8x128xf32> to vector<8x128xf32>
      %22 = vector.shape_cast %19 : vector<8x128xf32> to vector<1x8x128xf32>
      tpu.vector_store %arg5[%c0_12, %c0_13, %c0_14], %22 {strides = array<i32>} : memref<1x8x128xf32, #tpu.memory_space<vmem>>, vector<1x8x128xf32>,
    } else {
    }
    %c0 = arith.constant 0 : index
    %c0_1 = arith.constant 0 : index
    %5 = vector.load %arg2[%c0, %c0_1] : memref<16x128xf32, #tpu.memory_space<vmem>>, vector<16x128xf32>
    %c0_2 = arith.constant 0 : index
    %c0_3 = arith.constant 0 : index
    %6 = vector.load %arg3[%c0_2, %c0_3] : memref<16x128xf32, #tpu.memory_space<vmem>>, vector<16x128xf32>
    %c0_4 = arith.constant 0 : index
    %c0_5 = arith.constant 0 : index
    %7 = vector.load %arg4[%c0_4, %c0_5] : memref<16x128xf32, #tpu.memory_space<vmem>>, vector<16x128xf32>
    %c16_i32 = arith.constant 16 : i32
    %8 = arith.muli %1, %c16_i32 : i32
    %c1_i32_6 = arith.constant 1 : i32
    %9 = arith.cmpi slt, %1, %c1_i32_6 : i32
    %c16_i32_7 = arith.constant 16 : i32
    %10 = arith.addi %8, %c16_i32_7 : i32
    %c12_i32 = arith.constant 12 : i32
    %11 = arith.cmpi sgt, %10, %c12_i32 : i32
    %true = arith.constant true
    %12 = arith.xori %11, %true : i1
    %13 = arith.andi %9, %12 : i1
    %14 = arith.extui %13 : i1 to i32
    %cst = arith.constant 9.99999997E-7 : f32
    %c0_i32_8 = arith.constant 0 : i32
    %15 = arith.cmpi ne, %14, %c0_i32_8 : i32
    scf.if %15 {
      %19 = arith.mulf %6, %7 : vector<16x128xf32>
      %20 = vector.broadcast %cst : f32 to vector<16x128xf32>
      %21 = arith.maximumf %5, %20 : vector<16x128xf32>
      %22 = math.log %21 : vector<16x128xf32>
      %23 = arith.mulf %19, %22 : vector<16x128xf32>
      %24 = arith.subf %7, %19 : vector<16x128xf32>
      %cst_11 = arith.constant 1.000000e+00 : f32
      %25 = vector.broadcast %cst_11 : f32 to vector<16x128xf32>
      %26 = arith.subf %25, %5 : vector<16x128xf32>
      %27 = vector.broadcast %cst : f32 to vector<16x128xf32>
      %28 = arith.maximumf %26, %27 : vector<16x128xf32>
      %29 = math.log %28 : vector<16x128xf32>
      %30 = arith.mulf %24, %29 : vector<16x128xf32>
      %c0_12 = arith.constant 0 : index
      %c0_13 = arith.constant 0 : index
      %c0_14 = arith.constant 0 : index
      %31 = vector.load %arg5[%c0_12, %c0_13, %c0_14] : memref<1x8x128xf32, #tpu.memory_space<vmem>>, vector<1x1x128xf32>
      %32 = vector.shape_cast %31 : vector<1x1x128xf32> to vector<1x128xf32>
      %cst_15 = arith.constant dense<0.000000e+00> : vector<128xf32>
      %33 = vector.multi_reduction <add>, %19, %cst_15 [0] : vector<16x128xf32> to vector<128xf32>
      %34 = vector.shape_cast %33 : vector<128xf32> to vector<1x128xf32>
      %35 = arith.addf %32, %34 : vector<1x128xf32>
      %c0_16 = arith.constant 0 : index
      %c0_17 = arith.constant 0 : index
      %c0_18 = arith.constant 0 : index
      %36 = vector.load %arg5[%c0_16, %c0_17, %c0_18] : memref<1x8x128xf32, #tpu.memory_space<vmem>>, vector<1x1x128xf32>
      %37 = vector.shape_cast %36 : vector<1x1x128xf32> to vector<1x128xf32>
      %38 = vector.shape_cast %35 : vector<1x128xf32> to vector<1x1x128xf32>
      tpu.vector_store %arg5[%c0_16, %c0_17, %c0_18], %38 {strides = array<i32>} : memref<1x8x128xf32, #tpu.memory_space<vmem>>, vector<1x1x128xf32>,
      %c0_19 = arith.constant 0 : index
      %c1 = arith.constant 1 : index
      %c0_20 = arith.constant 0 : index
      %39 = vector.load %arg5[%c0_19, %c1, %c0_20] : memref<1x8x128xf32, #tpu.memory_space<vmem>>, vector<1x1x128xf32>
      %40 = vector.shape_cast %39 : vector<1x1x128xf32> to vector<1x128xf32>
      %cst_21 = arith.constant dense<0.000000e+00> : vector<128xf32>
      %41 = vector.multi_reduction <add>, %7, %cst_21 [0] : vector<16x128xf32> to vector<128xf32>
      %42 = vector.shape_cast %41 : vector<128xf32> to vector<1x128xf32>
      %43 = arith.addf %40, %42 : vector<1x128xf32>
      %c0_22 = arith.constant 0 : index
      %c1_23 = arith.constant 1 : index
      %c0_24 = arith.constant 0 : index
      %44 = vector.load %arg5[%c0_22, %c1_23, %c0_24] : memref<1x8x128xf32, #tpu.memory_space<vmem>>, vector<1x1x128xf32>
      %45 = vector.shape_cast %44 : vector<1x1x128xf32> to vector<1x128xf32>
      %46 = vector.shape_cast %43 : vector<1x128xf32> to vector<1x1x128xf32>
      tpu.vector_store %arg5[%c0_22, %c1_23, %c0_24], %46 {strides = array<i32>} : memref<1x8x128xf32, #tpu.memory_space<vmem>>, vector<1x1x128xf32>,
      %c0_25 = arith.constant 0 : index
      %c2 = arith.constant 2 : index
      %c0_26 = arith.constant 0 : index
      %47 = vector.load %arg5[%c0_25, %c2, %c0_26] : memref<1x8x128xf32, #tpu.memory_space<vmem>>, vector<1x1x128xf32>
      %48 = vector.shape_cast %47 : vector<1x1x128xf32> to vector<1x128xf32>
      %cst_27 = arith.constant dense<0.000000e+00> : vector<128xf32>
      %49 = vector.multi_reduction <add>, %23, %cst_27 [0] : vector<16x128xf32> to vector<128xf32>
      %50 = vector.shape_cast %49 : vector<128xf32> to vector<1x128xf32>
      %51 = arith.addf %48, %50 : vector<1x128xf32>
      %c0_28 = arith.constant 0 : index
      %c2_29 = arith.constant 2 : index
      %c0_30 = arith.constant 0 : index
      %52 = vector.load %arg5[%c0_28, %c2_29, %c0_30] : memref<1x8x128xf32, #tpu.memory_space<vmem>>, vector<1x1x128xf32>
      %53 = vector.shape_cast %52 : vector<1x1x128xf32> to vector<1x128xf32>
      %54 = vector.shape_cast %51 : vector<1x128xf32> to vector<1x1x128xf32>
      tpu.vector_store %arg5[%c0_28, %c2_29, %c0_30], %54 {strides = array<i32>} : memref<1x8x128xf32, #tpu.memory_space<vmem>>, vector<1x1x128xf32>,
      %c0_31 = arith.constant 0 : index
      %c3 = arith.constant 3 : index
      %c0_32 = arith.constant 0 : index
      %55 = vector.load %arg5[%c0_31, %c3, %c0_32] : memref<1x8x128xf32, #tpu.memory_space<vmem>>, vector<1x1x128xf32>
      %56 = vector.shape_cast %55 : vector<1x1x128xf32> to vector<1x128xf32>
      %cst_33 = arith.constant dense<0.000000e+00> : vector<128xf32>
      %57 = vector.multi_reduction <add>, %30, %cst_33 [0] : vector<16x128xf32> to vector<128xf32>
      %58 = vector.shape_cast %57 : vector<128xf32> to vector<1x128xf32>
      %59 = arith.addf %56, %58 : vector<1x128xf32>
      %c0_34 = arith.constant 0 : index
      %c3_35 = arith.constant 3 : index
      %c0_36 = arith.constant 0 : index
      %60 = vector.load %arg5[%c0_34, %c3_35, %c0_36] : memref<1x8x128xf32, #tpu.memory_space<vmem>>, vector<1x1x128xf32>
      %61 = vector.shape_cast %60 : vector<1x1x128xf32> to vector<1x128xf32>
      %62 = vector.shape_cast %59 : vector<1x128xf32> to vector<1x1x128xf32>
      tpu.vector_store %arg5[%c0_34, %c3_35, %c0_36], %62 {strides = array<i32>} : memref<1x8x128xf32, #tpu.memory_space<vmem>>, vector<1x1x128xf32>,
    } else {
    }
    %16 = arith.andi %9, %11 : i1
    %17 = arith.extui %16 : i1 to i32
    %cst_9 = arith.constant 9.99999997E-7 : f32
    %c0_i32_10 = arith.constant 0 : i32
    %18 = arith.cmpi ne, %17, %c0_i32_10 : i32
    scf.if %18 {
      %19 = tpu.iota {dimensions = array<i32: 0>} : vector<16x128xi32>
      %20 = vector.broadcast %8 : i32 to vector<16x128xi32>
      %21 = arith.addi %20, %19 : vector<16x128xi32>
      %c12_i32_11 = arith.constant 12 : i32
      %22 = vector.broadcast %c12_i32_11 : i32 to vector<16x128xi32>
      %23 = arith.cmpi slt, %21, %22 : vector<16x128xi32>
      %cst_12 = arith.constant 5.000000e-01 : f32
      %24 = vector.broadcast %cst_12 : f32 to vector<16x128xf32>
      %25 = arith.select %23, %5, %24 : vector<16x128xi1>, vector<16x128xf32>
      %cst_13 = arith.constant 0.000000e+00 : f32
      %26 = vector.broadcast %cst_13 : f32 to vector<16x128xf32>
      %27 = arith.select %23, %6, %26 : vector<16x128xi1>, vector<16x128xf32>
      %cst_14 = arith.constant 0.000000e+00 : f32
      %28 = vector.broadcast %cst_14 : f32 to vector<16x128xf32>
      %29 = arith.select %23, %7, %28 : vector<16x128xi1>, vector<16x128xf32>
      %30 = arith.mulf %27, %29 : vector<16x128xf32>
      %31 = vector.broadcast %cst_9 : f32 to vector<16x128xf32>
      %32 = arith.maximumf %25, %31 : vector<16x128xf32>
      %33 = math.log %32 : vector<16x128xf32>
      %34 = arith.mulf %30, %33 : vector<16x128xf32>
      %35 = arith.subf %29, %30 : vector<16x128xf32>
      %cst_15 = arith.constant 1.000000e+00 : f32
      %36 = vector.broadcast %cst_15 : f32 to vector<16x128xf32>
      %37 = arith.subf %36, %25 : vector<16x128xf32>
      %38 = vector.broadcast %cst_9 : f32 to vector<16x128xf32>
      %39 = arith.maximumf %37, %38 : vector<16x128xf32>
      %40 = math.log %39 : vector<16x128xf32>
      %41 = arith.mulf %35, %40 : vector<16x128xf32>
      %c0_16 = arith.constant 0 : index
      %c0_17 = arith.constant 0 : index
      %c0_18 = arith.constant 0 : index
      %42 = vector.load %arg5[%c0_16, %c0_17, %c0_18] : memref<1x8x128xf32, #tpu.memory_space<vmem>>, vector<1x1x128xf32>
      %43 = vector.shape_cast %42 : vector<1x1x128xf32> to vector<1x128xf32>
      %cst_19 = arith.constant dense<0.000000e+00> : vector<128xf32>
      %44 = vector.multi_reduction <add>, %30, %cst_19 [0] : vector<16x128xf32> to vector<128xf32>
      %45 = vector.shape_cast %44 : vector<128xf32> to vector<1x128xf32>
      %46 = arith.addf %43, %45 : vector<1x128xf32>
      %c0_20 = arith.constant 0 : index
      %c0_21 = arith.constant 0 : index
      %c0_22 = arith.constant 0 : index
      %47 = vector.load %arg5[%c0_20, %c0_21, %c0_22] : memref<1x8x128xf32, #tpu.memory_space<vmem>>, vector<1x1x128xf32>
      %48 = vector.shape_cast %47 : vector<1x1x128xf32> to vector<1x128xf32>
      %49 = vector.shape_cast %46 : vector<1x128xf32> to vector<1x1x128xf32>
      tpu.vector_store %arg5[%c0_20, %c0_21, %c0_22], %49 {strides = array<i32>} : memref<1x8x128xf32, #tpu.memory_space<vmem>>, vector<1x1x128xf32>,
      %c0_23 = arith.constant 0 : index
      %c1 = arith.constant 1 : index
      %c0_24 = arith.constant 0 : index
      %50 = vector.load %arg5[%c0_23, %c1, %c0_24] : memref<1x8x128xf32, #tpu.memory_space<vmem>>, vector<1x1x128xf32>
      %51 = vector.shape_cast %50 : vector<1x1x128xf32> to vector<1x128xf32>
      %cst_25 = arith.constant dense<0.000000e+00> : vector<128xf32>
      %52 = vector.multi_reduction <add>, %29, %cst_25 [0] : vector<16x128xf32> to vector<128xf32>
      %53 = vector.shape_cast %52 : vector<128xf32> to vector<1x128xf32>
      %54 = arith.addf %51, %53 : vector<1x128xf32>
      %c0_26 = arith.constant 0 : index
      %c1_27 = arith.constant 1 : index
      %c0_28 = arith.constant 0 : index
      %55 = vector.load %arg5[%c0_26, %c1_27, %c0_28] : memref<1x8x128xf32, #tpu.memory_space<vmem>>, vector<1x1x128xf32>
      %56 = vector.shape_cast %55 : vector<1x1x128xf32> to vector<1x128xf32>
      %57 = vector.shape_cast %54 : vector<1x128xf32> to vector<1x1x128xf32>
      tpu.vector_store %arg5[%c0_26, %c1_27, %c0_28], %57 {strides = array<i32>} : memref<1x8x128xf32, #tpu.memory_space<vmem>>, vector<1x1x128xf32>,
      %c0_29 = arith.constant 0 : index
      %c2 = arith.constant 2 : index
      %c0_30 = arith.constant 0 : index
      %58 = vector.load %arg5[%c0_29, %c2, %c0_30] : memref<1x8x128xf32, #tpu.memory_space<vmem>>, vector<1x1x128xf32>
      %59 = vector.shape_cast %58 : vector<1x1x128xf32> to vector<1x128xf32>
      %cst_31 = arith.constant dense<0.000000e+00> : vector<128xf32>
      %60 = vector.multi_reduction <add>, %34, %cst_31 [0] : vector<16x128xf32> to vector<128xf32>
      %61 = vector.shape_cast %60 : vector<128xf32> to vector<1x128xf32>
      %62 = arith.addf %59, %61 : vector<1x128xf32>
      %c0_32 = arith.constant 0 : index
      %c2_33 = arith.constant 2 : index
      %c0_34 = arith.constant 0 : index
      %63 = vector.load %arg5[%c0_32, %c2_33, %c0_34] : memref<1x8x128xf32, #tpu.memory_space<vmem>>, vector<1x1x128xf32>
      %64 = vector.shape_cast %63 : vector<1x1x128xf32> to vector<1x128xf32>
      %65 = vector.shape_cast %62 : vector<1x128xf32> to vector<1x1x128xf32>
      tpu.vector_store %arg5[%c0_32, %c2_33, %c0_34], %65 {strides = array<i32>} : memref<1x8x128xf32, #tpu.memory_space<vmem>>, vector<1x1x128xf32>,
      %c0_35 = arith.constant 0 : index
      %c3 = arith.constant 3 : index
      %c0_36 = arith.constant 0 : index
      %66 = vector.load %arg5[%c0_35, %c3, %c0_36] : memref<1x8x128xf32, #tpu.memory_space<vmem>>, vector<1x1x128xf32>
      %67 = vector.shape_cast %66 : vector<1x1x128xf32> to vector<1x128xf32>
      %cst_37 = arith.constant dense<0.000000e+00> : vector<128xf32>
      %68 = vector.multi_reduction <add>, %41, %cst_37 [0] : vector<16x128xf32> to vector<128xf32>
      %69 = vector.shape_cast %68 : vector<128xf32> to vector<1x128xf32>
      %70 = arith.addf %67, %69 : vector<1x128xf32>
      %c0_38 = arith.constant 0 : index
      %c3_39 = arith.constant 3 : index
      %c0_40 = arith.constant 0 : index
      %71 = vector.load %arg5[%c0_38, %c3_39, %c0_40] : memref<1x8x128xf32, #tpu.memory_space<vmem>>, vector<1x1x128xf32>
      %72 = vector.shape_cast %71 : vector<1x1x128xf32> to vector<1x128xf32>
      %73 = vector.shape_cast %70 : vector<1x128xf32> to vector<1x1x128xf32>
      tpu.vector_store %arg5[%c0_38, %c3_39, %c0_40], %73 {strides = array<i32>} : memref<1x8x128xf32, #tpu.memory_space<vmem>>, vector<1x1x128xf32>,
    } else {
    }
    return
  }
  func.func @transform_0(%arg0: i32, %arg1: i32) -> (i32, i32) {
    %c1_i32 = arith.constant 1 : i32
    %0 = arith.muli %arg0, %c1_i32 : i32
    %1 = arith.addi %0, %arg1 : i32
    %c0_i32 = arith.constant 0 : i32
    %2 = arith.minsi %1, %c0_i32 : i32
    %c0_i32_0 = arith.constant 0 : i32
    %c0_i32_1 = arith.constant 0 : i32
    return %2, %c0_i32_0 : i32, i32
  }
  func.func @transform_1(%arg0: i32, %arg1: i32) -> (i32, i32) {
    %c1_i32 = arith.constant 1 : i32
    %0 = arith.muli %arg0, %c1_i32 : i32
    %1 = arith.addi %0, %arg1 : i32
    %c0_i32 = arith.constant 0 : i32
    %2 = arith.minsi %1, %c0_i32 : i32
    %c0_i32_0 = arith.constant 0 : i32
    %c0_i32_1 = arith.constant 0 : i32
    return %2, %c0_i32_0 : i32, i32
  }
  func.func @transform_2(%arg0: i32, %arg1: i32) -> (i32, i32) {
    %c1_i32 = arith.constant 1 : i32
    %0 = arith.muli %arg0, %c1_i32 : i32
    %1 = arith.addi %0, %arg1 : i32
    %c0_i32 = arith.constant 0 : i32
    %2 = arith.minsi %1, %c0_i32 : i32
    %c0_i32_0 = arith.constant 0 : i32
    %c0_i32_1 = arith.constant 0 : i32
    return %2, %c0_i32_0 : i32, i32
  }
  func.func @transform_3(%arg0: i32, %arg1: i32) -> (i32, i32, i32) {
    %c0_i32 = arith.constant 0 : i32
    %c0_i32_0 = arith.constant 0 : i32
    %c0_i32_1 = arith.constant 0 : i32
    return %arg0, %c0_i32, %c0_i32_0 : i32, i32, i32
  }
}

</mosaic_0001>

<bundles_post_ra>
// kernel: weighted_cross_entropy_loss.1
= control target key start
LH: loop header
LB: loop body
LE: loop exit
PB: predicated region body
PF: predicated region fallthrough
CT: control target
= control target key end

     0   :  { %v197_v0 = vlaneseq  ;;  %v304_v1 = vmov 0.0   ;;  %s370_s3 = inlined_call_operand.vmem [shape: f32[1,8,128], index: 3, kind: output, shape index: {}]   ;;  %s371_s0 = inlined_call_operand.vmem [shape: f32[12,128], index: 0, kind: input, shape index: {}]   ;;  %s372_s1 = inlined_call_operand.vmem [shape: f32[12,128], index: 1, kind: input, shape index: {}]   ;;  %s373_s2 = inlined_call_operand.vmem [shape: f32[12,128], index: 2, kind: input, shape index: {}]  }
   0x1   :  { %115 = vst [vmem:[%s370_s3] sm:$0xff] %v304_v1  ;;  %v116_v3 = vld [vmem:[%s371_s0] sm:$0xff]  ;;  %v119_v6 = vld [vmem:[%s372_s1 + $0x8] sm:$0xff] }
   0x2   :  { %v198_v2 = vshrl.u32 %v197_v0, 7  ;;  %v213_v4 = vmax.f32 %v116_v3, 1e-06  ;;  %v223_v5 = vsub.f32 1.0, %v116_v3  ;;  %v121_v7 = vld [vmem:[%s373_s2 + $0x8] sm:$0xff]  ;;  %v118_v10 = vld [vmem:[%s372_s1] sm:$0xff] }
   0x3   :  { %v117_v9 = vld [vmem:[%s371_s0 + $0x8] sm:$0xff]  ;;  %v120_v11 = vld [vmem:[%s373_s2] sm:$0xff] }
   0x4   :  { %v199_v8 = vadd.s32 8, %v198_v2  ;;  %296 = vlog2.f32 %v213_v4  ;;  %v225_v12 = vmax.f32 %v223_v5, 1e-06  ;;  %v211_v16 = vmul.f32 %v120_v11, %v118_v10 }
   0x6   :  { %vm204_vm0 = vcmp.lt.s32.totalorder %v199_v8, 12  ;;  %298 = vlog2.f32 %v225_v12  ;;  %v221_v34 = vsub.f32 %v120_v11, %v211_v16 }
   0x7   :  { %v208_v13 = vsel %vm204_vm0, %v119_v6, 0.0  ;;  %v210_v14 = vsel %vm204_vm0, %v121_v7, 0.0  ;;  %v206_v15 = vsel %vm204_vm0, %v117_v9, 0.5 }
   0x8   :  { %v212_v17 = vmul.f32 %v210_v14, %v208_v13  ;;  %v244_v18 = vadd.f32 %v210_v14, %v120_v11  ;;  %v214_v19 = vmax.f32 %v206_v15, 1e-06  ;;  %v224_v20 = vsub.f32 1.0, %v206_v15  ;;  %v243_v42 = vld [vmem:[%s370_s3 + $0x1] sm:$0x1] }
   0x9   :  { %v233_v48 = vld [vmem:[%s370_s3] sm:$0x1]  ;;  %v253_v63 = vld [vmem:[%s370_s3 + $0x2] sm:$0x1]  ;;  %v263_v4 = vld [vmem:[%s370_s3 + $0x3] sm:$0x1] }
   0xa   :  { %v234_v21 = vadd.f32 %v212_v17, %v211_v16  ;;  %v245_v22 = vrot.slane %v244_v18, 4  ;;  %300 = vlog2.f32 %v214_v19  ;;  %v297_v23 = vpop.eup %296  ;;  %v226_v24 = vmax.f32 %v224_v20, 1e-06 }
   0xb   :  { %v216_v28 = vmul.f32 0.6931472, %v297_v23  ;;  %v222_v40 = vsub.f32 %v210_v14, %v212_v17 }
   0xc   :  { %v235_v25 = vrot.slane %v234_v21, 4  ;;  %v246_v26 = vadd.f32 %v245_v22, %v244_v18  ;;  %v299_v27 = vpop.eup %298  ;;  %302 = vlog2.f32 %v226_v24 }
   0xd   :  { %v228_v35 = vmul.f32 0.6931472, %v299_v27  ;;  %v219_v37 = vmul.f32 %v216_v28, %v211_v16 }
   0xe   :  { %v236_v29 = vadd.f32 %v235_v25, %v234_v21  ;;  %v247_v30 = vrot.slane %v246_v26, 2 }
   0xf   :  { %v231_v47 = vmul.f32 %v228_v35, %v221_v34 }
  0x10   :  { %v301_v31 = vpop.eup %300  ;;  %v237_v32 = vrot.slane %v236_v29, 2  ;;  %v248_v33 = vadd.f32 %v247_v30, %v246_v26 }
  0x11   :  { %v218_v36 = vmul.f32 0.6931472, %v301_v31 }
  0x12   :  { %v238_v38 = vadd.f32 %v237_v32, %v236_v29  ;;  %v249_v39 = vrot.slane %v248_v33, 1  ;;  %v303_v41 = vpop.eup %302 }
  0x13   :  { %v220_v43 = vmul.f32 %v218_v36, %v212_v17  ;;  %v230_v46 = vmul.f32 0.6931472, %v303_v41 }
  0x14   :  { %v239_v44 = vrot.slane %v238_v38, 1  ;;  %v250_v45 = vadd.f32 %v249_v39, %v248_v33 }
  0x15   :  { %v254_v49 = vadd.f32 %v220_v43, %v219_v37  ;;  %v232_v52 = vmul.f32 %v230_v46, %v222_v40 }
  0x16   :  { %v240_v50 = vadd.f32 %v239_v44, %v238_v38  ;;  %v251_v51 = vadd.f32 %v250_v45, %v243_v42 }
  0x17   :  { %v255_v53 = vrot.slane %v254_v49, 4  ;;  %v264_v55 = vadd.f32 %v232_v52, %v231_v47 }
  0x18   :  { %v241_v54 = vadd.f32 %v240_v50, %v233_v48  ;;  %252 = vst [vmem:[%s370_s3 + $0x1] sm:$0x1] %v251_v51 }
  0x19   :  { %v256_v56 = vadd.f32 %v255_v53, %v254_v49  ;;  %v265_v57 = vrot.slane %v264_v55, 4 }
  0x1a   :  { %242 = vst [vmem:[%s370_s3] sm:$0x1] %v241_v54 }
  0x1b   :  { %v257_v58 = vrot.slane %v256_v56, 2  ;;  %v266_v59 = vadd.f32 %v265_v57, %v264_v55 }
  0x1d   :  { %v258_v60 = vadd.f32 %v257_v58, %v256_v56  ;;  %v267_v61 = vrot.slane %v266_v59, 2 }
  0x1f   :  { %v259_v62 = vrot.slane %v258_v60, 1  ;;  %v268_v0 = vadd.f32 %v267_v61, %v266_v59 }
  0x21   :  { %v260_v1 = vadd.f32 %v259_v62, %v258_v60  ;;  %v269_v2 = vrot.slane %v268_v0, 1 }
  0x23   :  { %v261_v3 = vadd.f32 %v260_v1, %v253_v63  ;;  %v270_v5 = vadd.f32 %v269_v2, %v268_v0 }
  0x25   :  { %262 = vst [vmem:[%s370_s3 + $0x2] sm:$0x1] %v261_v3  ;;  %v271_v6 = vadd.f32 %v270_v5, %v263_v4 }
  0x27   :  { %272 = vst [vmem:[%s370_s3 + $0x3] sm:$0x1] %v271_v6 }

</bundles_post_ra>
